<compile_context>
chip_gen: v6e
topology: v6e:2x2x1
jax: 0.10.0
libtpu: 0.0.40
codegen_flags: <defaults>
</compile_context>

<pallas_src>
import math

import jax
import jax.numpy as jnp
from jax import lax
from jax.experimental import pallas as pl
from jax.experimental.pallas import tpu as pltpu


# ----------------------------- Tiled linear -------------------------------- #
def _linear_kernel(x_ref, w_ref, b_ref, o_ref, acc_ref):
    # y = x @ w + b, accumulated over the K grid axis in f32.
    @pl.when(pl.program_id(2) == 0)
    def _init():
        acc_ref[...] = jnp.zeros_like(acc_ref)

    acc_ref[...] += jnp.dot(
        x_ref[...].astype(jnp.bfloat16),
        w_ref[...].astype(jnp.bfloat16),
        preferred_element_type=jnp.float32,
    )

    @pl.when(pl.program_id(2) == pl.num_programs(2) - 1)
    def _finalize():
        o_ref[...] = (acc_ref[...] + b_ref[...].astype(jnp.float32)).astype(o_ref.dtype)


def _pick_tile(dim, preferred, align):
    """Largest multiple of `align` <= preferred that divides dim; else the full dim."""
    if dim <= preferred:
        return dim
    t = (preferred // align) * align
    while t >= align:
        if dim % t == 0:
            return t
        t -= align
    return dim


def pallas_linear(x, w, b, *, tm_pref=256, tn_pref=512, tk_pref=512):
    """x: [M, K], w: [K, N], b: [N] -> [M, N].  Tiled + auto-pipelined GEMM."""
    M, K = x.shape
    Kw, N = w.shape
    assert K == Kw
    tm = _pick_tile(M, tm_pref, 8)
    tn = _pick_tile(N, tn_pref, 128)
    tk = _pick_tile(K, tk_pref, 128)
    b2 = b.reshape(1, N)
    grid = (M // tm, N // tn, K // tk)
    return pl.pallas_call(
        _linear_kernel,
        out_shape=jax.ShapeDtypeStruct((M, N), x.dtype),
        grid_spec=pltpu.PrefetchScalarGridSpec(
            num_scalar_prefetch=0,
            grid=grid,
            in_specs=[
                pl.BlockSpec((tm, tk), lambda i, j, k: (i, k)),
                pl.BlockSpec((tk, tn), lambda i, j, k: (k, j)),
                pl.BlockSpec((1, tn), lambda i, j, k: (0, j)),
            ],
            out_specs=pl.BlockSpec((tm, tn), lambda i, j, k: (i, j)),
            scratch_shapes=[pltpu.VMEM((tm, tn), jnp.float32)],
        ),
        compiler_params=pltpu.CompilerParams(
            dimension_semantics=("parallel", "parallel", "arbitrary"),
            vmem_limit_bytes=32 * 1024 * 1024,
        ),
    )(x, w, b2)


# --------------------------- Attention kernel ------------------------------ #
def _make_attn_kernel(nb_heads, d_head, has_mask):
    HD = nb_heads * d_head

    def _attn_body(x, mask):
        # x: [L, 3*HD] f32 (Q portion already pre-scaled by 1/sqrt(d_head)).
        # mask: [1, L] int32 (nonzero => padded key position) or None.
        outs = []
        for hh in range(nb_heads):  # static unroll; back-to-back MXU problems
            q = x[:, hh * d_head:(hh + 1) * d_head]
            k = x[:, HD + hh * d_head:HD + (hh + 1) * d_head]
            v = x[:, 2 * HD + hh * d_head:2 * HD + (hh + 1) * d_head]
            # scores [L, L]: contract the last dim of both (no explicit transpose)
            s = lax.dot_general(
                q.astype(jnp.bfloat16), k.astype(jnp.bfloat16),
                (((1,), (1,)), ((), ())),
                preferred_element_type=jnp.float32,
            )
            if mask is not None:
                s = jnp.where(mask != 0, jnp.float32(-1e9), s)
            # numerically-stable softmax over keys (f32 elementwise)
            s = s - jnp.max(s, axis=-1, keepdims=True)
            p = jnp.exp(s)
            p = p * pl.reciprocal(jnp.sum(p, axis=-1, keepdims=True), approx=True)
            o = jnp.dot(p.astype(jnp.bfloat16), v.astype(jnp.bfloat16),
                        preferred_element_type=jnp.float32)  # [L, Dh]
            outs.append(o)
        return jnp.concatenate(outs, axis=-1)  # [L, HD] lane-dense

    if has_mask:
        def kernel(mask_ref, qkv_ref, o_ref):
            x = qkv_ref[0]          # [L, 3*HD]
            m = mask_ref[...]       # [1, L]
            o_ref[0] = _attn_body(x, m).astype(o_ref.dtype)
    else:
        def kernel(qkv_ref, o_ref):
            x = qkv_ref[0]
            o_ref[0] = _attn_body(x, None).astype(o_ref.dtype)
    return kernel


def pallas_attention(qkv, nb_heads, d_head, att_mask=None):
    """qkv: [B, L, 3*H*Dh] (Q pre-scaled), att_mask: [B, L] or None -> [B, L, H*Dh]."""
    B, L, three_hd = qkv.shape
    HD = nb_heads * d_head
    assert three_hd == 3 * HD
    has_mask = att_mask is not None
    kernel = _make_attn_kernel(nb_heads, d_head, has_mask)

    qkv_spec = pl.BlockSpec((1, L, three_hd), lambda b: (b, 0, 0))
    out_spec = pl.BlockSpec((1, L, HD), lambda b: (b, 0, 0))
    if has_mask:
        in_specs = [pl.BlockSpec((1, L), lambda b: (b, 0)), qkv_spec]
        args = (att_mask.astype(jnp.int32), qkv)
    else:
        in_specs = [qkv_spec]
        args = (qkv,)

    return pl.pallas_call(
        kernel,
        out_shape=jax.ShapeDtypeStruct((B, L, HD), qkv.dtype),
        grid=(B,),
        in_specs=in_specs,
        out_specs=out_spec,
        compiler_params=pltpu.CompilerParams(
            dimension_semantics=("parallel",),
            vmem_limit_bytes=32 * 1024 * 1024,
        ),
    )(*args)


# --------------------------- Module forward -------------------------------- #
def multi_head_attention(h, params, att_mask=None):
    """
    h:        [B, L, d_model]
    att_mask: [B, L] (nonzero => padded position) or None
    returns   [B, L, d_model]
    """
    B, L, d_model = h.shape
    H, Dh = params["nb_heads"], params["d_head"]
    HD = H * Dh

    x2 = h.reshape(B * L, d_model)
    # Fused Q/K/V projection: one tiled GEMM (scale folded into the Q slice).
    qkv = pallas_linear(x2, params["wqkv"], params["bqkv"])        # [B*L, 3*HD]
    qkv = qkv.reshape(B, L, 3 * HD)                                # free reshape

    att = pallas_attention(qkv, H, Dh, att_mask)                   # [B, L, HD]

    out = pallas_linear(att.reshape(B * L, HD), params["wo"], params["bo"])
    return out.reshape(B, L, d_model)


# --------------------------- Param init ------------------------------------ #
def xavier_uniform(key, shape, gain=1.0):
    fan_out, fan_in = shape  # torch Linear weight is [out, in]
    limit = gain * math.sqrt(6.0 / (fan_in + fan_out))
    return jax.random.uniform(key, shape, jnp.float32, -limit, limit)


def init_params(key, d_model, d_head, nb_heads):
    dh = d_head * nb_heads
    ks = jax.random.split(key, 8)
    g = 1.0 / math.sqrt(2.0)
    # store weights pre-transposed as [in, out] so kernels do x @ W
    wq = xavier_uniform(ks[0], (dh, d_model), gain=g).T
    wk = xavier_uniform(ks[1], (dh, d_model), gain=g).T
    wv = xavier_uniform(ks[2], (dh, d_model), gain=g).T
    wo = xavier_uniform(ks[3], (d_model, dh), gain=1.0).T
    bq = jax.random.uniform(ks[4], (dh,), jnp.float32, -0.1, 0.1)
    bk = jax.random.uniform(ks[5], (dh,), jnp.float32, -0.1, 0.1)
    bv = jax.random.uniform(ks[6], (dh,), jnp.float32, -0.1, 0.1)
    bo = jax.random.uniform(ks[7], (d_model,), jnp.float32, -0.1, 0.1)
    # Fused QKV weight/bias with 1/sqrt(d_head) folded into the Q portion.
    scale = 1.0 / math.sqrt(d_head)
    wqkv = jnp.concatenate([wq * scale, wk, wv], axis=1)   # [d_model, 3*dh]
    bqkv = jnp.concatenate([bq * scale, bk, bv])           # [3*dh]
    return dict(wq=wq, wk=wk, wv=wv, wo=wo, bq=bq, bk=bk, bv=bv, bo=bo,
                wqkv=wqkv, bqkv=bqkv, nb_heads=nb_heads, d_head=d_head)


# --------------------------- Pure-JAX reference ----------------------------- #
def reference(h, params, att_mask):
    # Faithful f32 re-implementation of the PyTorch module (eval mode).
    B, L, d_model = h.shape
    H, Dh = params["nb_heads"], params["d_head"]
    x = h.reshape(B * L, d_model)
    q = (x @ params["wq"] + params["bq"]).reshape(B, L, H, Dh).transpose(0, 2, 1, 3)
    k = (x @ params["wk"] + params["bk"]).reshape(B, L, H, Dh).transpose(0, 2, 1, 3)
    v = (x @ params["wv"] + params["bv"]).reshape(B, L, H, Dh).transpose(0, 2, 1, 3)
    s = jnp.einsum("bhqd,bhkd->bhqk", q, k) / math.sqrt(Dh)
    if att_mask is not None:
        s = jnp.where(att_mask[:, None, None, :] != 0, -1e9, s)
    p = jax.nn.softmax(s, axis=-1)
    o = jnp.einsum("bhqk,bhkd->bhqd", p, v).transpose(0, 2, 1, 3).reshape(B * L, H * Dh)
    return (o @ params["wo"] + params["bo"]).reshape(B, L, d_model)


if __name__ == "__main__":
    B, L, d_model, nb_heads, d_head = 2, 8, 32, 4, 8
    key = jax.random.PRNGKey(0)
    k_h, k_p = jax.random.split(key, 2)

    h = jax.random.normal(k_h, (B, L, d_model), dtype=jnp.float32)
    params = init_params(k_p, d_model, d_head, nb_heads)
    # padding mask: last 2 positions of batch 1 are padded
    att_mask = jnp.zeros((B, L), dtype=jnp.int32).at[1, -2:].set(1)

    out = multi_head_attention(h, params, att_mask)
    out = jax.block_until_ready(out)
    ref = reference(h, params, att_mask)
    assert out.shape == (B, L, d_model)
    # bf16 MXU inputs + approx reciprocal -> compare against f32 ref with loose tol
    assert jnp.allclose(out, ref, atol=3e-2, rtol=3e-2), (
        f"mismatch vs reference, max abs err {float(jnp.max(jnp.abs(out - ref)))}")

    # no-mask fast path (kernel variant without the select / mask stream)
    out_nm = jax.block_until_ready(multi_head_attention(h, params, None))
    ref_nm = reference(h, params, None)
    assert jnp.allclose(out_nm, ref_nm, atol=3e-2, rtol=3e-2), "mismatch (no-mask path)"

    print("KERNEL_OK")
</pallas_src>

<mosaic_0001>
module attributes {stable_mosaic.version = 11 : i64} {
  func.func @_linear_kernel(%arg0: i32, %arg1: i32, %arg2: i32, %arg3: memref<16x32xf32, #tpu.memory_space<vmem>>, %arg4: memref<32x96xf32, #tpu.memory_space<vmem>>, %arg5: memref<1x96xf32, #tpu.memory_space<vmem>>, %arg6: memref<16x96xf32, #tpu.memory_space<vmem>>, %arg7: memref<16x96xf32, #tpu.memory_space<vmem>>) attributes {dimension_semantics = [#tpu.dimension_semantics<parallel>, #tpu.dimension_semantics<parallel>, #tpu.dimension_semantics<arbitrary>], iteration_bounds = array<i64: 1, 1, 1>, scalar_prefetch = 0 : i64, scratch_operands = 1 : i64, tpu.core_type = #tpu.core_type<tc>, window_params = [{transform_indices = @transform_0, window_bounds = array<i64: 16, 32>}, {transform_indices = @transform_1, window_bounds = array<i64: 32, 96>}, {transform_indices = @transform_2, window_bounds = array<i64: 1, 96>}, {transform_indices = @transform_3, window_bounds = array<i64: 16, 96>}]} {
    %c0_i32 = arith.constant 0 : i32
    %0 = arith.cmpi eq, %arg2, %c0_i32 : i32
    %1 = arith.extui %0 : i1 to i32
    %c0_i32_0 = arith.constant 0 : i32
    %2 = arith.cmpi ne, %1, %c0_i32_0 : i32
    scf.if %2 {
      %cst_10 = arith.constant 0.000000e+00 : f32
      %14 = vector.broadcast %cst_10 : f32 to vector<16x96xf32>
      %c0_11 = arith.constant 0 : index
      %c0_12 = arith.constant 0 : index
      %15 = vector.load %arg7[%c0_11, %c0_12] : memref<16x96xf32, #tpu.memory_space<vmem>>, vector<16x96xf32>
      tpu.vector_store %arg7[%c0_11, %c0_12], %14 {strides = array<i32>} : memref<16x96xf32, #tpu.memory_space<vmem>>, vector<16x96xf32>,
    } else {
    }
    %c0 = arith.constant 0 : index
    %c0_1 = arith.constant 0 : index
    %3 = vector.load %arg7[%c0, %c0_1] : memref<16x96xf32, #tpu.memory_space<vmem>>, vector<16x96xf32>
    %c0_2 = arith.constant 0 : index
    %c0_3 = arith.constant 0 : index
    %4 = vector.load %arg3[%c0_2, %c0_3] : memref<16x32xf32, #tpu.memory_space<vmem>>, vector<16x32xf32>
    %5 = arith.truncf %4 : vector<16x32xf32> to vector<16x32xbf16>
    %c0_4 = arith.constant 0 : index
    %c0_5 = arith.constant 0 : index
    %6 = vector.load %arg4[%c0_4, %c0_5] : memref<32x96xf32, #tpu.memory_space<vmem>>, vector<32x96xf32>
    %7 = arith.truncf %6 : vector<32x96xf32> to vector<32x96xbf16>
    %cst = arith.constant dense<0.000000e+00> : vector<16x96xf32>
    %8 = tpu.matmul %5, %7, %cst {dimension_numbers = #tpu.dot_dimension_numbers<[1], [0], [0], [1], [0, 0, 1, 1], [], []>} : vector<16x32xbf16>, vector<32x96xbf16>, vector<16x96xf32> -> vector<16x96xf32>
    %9 = arith.addf %3, %8 : vector<16x96xf32>
    %c0_6 = arith.constant 0 : index
    %c0_7 = arith.constant 0 : index
    %10 = vector.load %arg7[%c0_6, %c0_7] : memref<16x96xf32, #tpu.memory_space<vmem>>, vector<16x96xf32>
    tpu.vector_store %arg7[%c0_6, %c0_7], %9 {strides = array<i32>} : memref<16x96xf32, #tpu.memory_space<vmem>>, vector<16x96xf32>,
    %c0_i32_8 = arith.constant 0 : i32
    %11 = arith.cmpi eq, %arg2, %c0_i32_8 : i32
    %12 = arith.extui %11 : i1 to i32
    %c0_i32_9 = arith.constant 0 : i32
    %13 = arith.cmpi ne, %12, %c0_i32_9 : i32
    scf.if %13 {
      %c0_10 = arith.constant 0 : index
      %c0_11 = arith.constant 0 : index
      %14 = vector.load %arg7[%c0_10, %c0_11] : memref<16x96xf32, #tpu.memory_space<vmem>>, vector<16x96xf32>
      %c0_12 = arith.constant 0 : index
      %c0_13 = arith.constant 0 : index
      %15 = vector.load %arg5[%c0_12, %c0_13] : memref<1x96xf32, #tpu.memory_space<vmem>>, vector<1x96xf32>
      %16 = vector.broadcast %15 : vector<1x96xf32> to vector<16x96xf32>
      %17 = arith.addf %14, %16 : vector<16x96xf32>
      %c0_14 = arith.constant 0 : index
      %c0_15 = arith.constant 0 : index
      %18 = vector.load %arg6[%c0_14, %c0_15] : memref<16x96xf32, #tpu.memory_space<vmem>>, vector<16x96xf32>
      tpu.vector_store %arg6[%c0_14, %c0_15], %17 {strides = array<i32>} : memref<16x96xf32, #tpu.memory_space<vmem>>, vector<16x96xf32>,
    } else {
    }
    return
  }
  func.func @transform_0(%arg0: i32, %arg1: i32, %arg2: i32) -> (i32, i32) {
    %c0_i32 = arith.constant 0 : i32
    return %arg0, %arg2 : i32, i32
  }
  func.func @transform_1(%arg0: i32, %arg1: i32, %arg2: i32) -> (i32, i32) {
    %c0_i32 = arith.constant 0 : i32
    return %arg2, %arg1 : i32, i32
  }
  func.func @transform_2(%arg0: i32, %arg1: i32, %arg2: i32) -> (i32, i32) {
    %c0_i32 = arith.constant 0 : i32
    %c0_i32_0 = arith.constant 0 : i32
    return %c0_i32, %arg1 : i32, i32
  }
  func.func @transform_3(%arg0: i32, %arg1: i32, %arg2: i32) -> (i32, i32) {
    %c0_i32 = arith.constant 0 : i32
    return %arg0, %arg1 : i32, i32
  }
}

</mosaic_0001>

<bundles_post_ra>
// kernel: tpu_custom_call.1
= control target key start
LH: loop header
LB: loop body
LE: loop exit
PB: predicated region body
PF: predicated region fallthrough
CT: control target
= control target key end

     0   :  { %8 = vsyncpa [#allocation4], 0  ;;  %s286_s0 = inlined_call_operand.hbm [shape: f32[16,32], index: 0, kind: input, shape index: {}]   ;;  %s287_s1 = inlined_call_operand.hbm [shape: f32[32,96], index: 1, kind: input, shape index: {}]   ;;  %s288_s2 = inlined_call_operand.vmem [shape: f32[1,96], index: 2, kind: input, shape index: {}]   ;;  %s289_s3 = inlined_call_operand.hbm [shape: f32[16,96], index: 3, kind: output, shape index: {}]  }
   0x1   :  { %9 = vsyncpa [#allocation7], 0 }
   0x2   :  { %10 = vsyncpa [#allocation5], 0  ;;  %s232_s12 = smov [#allocation3]  }
   0x3   :  { %s16_s13 = sshll.u32 %s232_s12, 4  ;;  %s17_s13 = int_to_ptr.vmem [resolvable:$true] %s16_s13 }
   0x4   :  { %s174_s14 = scalar_lea.vmem %s17_s13, 256  ;;  %p179_p1 = scmp.lt.s32.totalorder %s17_s13, %s17_s13 }
   0x5   :  { %p175_p0 = scmp.ne.s32.totalorder %s17_s13, %s174_s14  ;;  %p180_p2 = scmp.lt.s32.totalorder %s174_s14, %s174_s14 }
   0x7   :  { %p181_p3 = por %p180_p2, %p179_p1 }
   0x9   :  { %p182_p4 = pnand %p181_p3, %p175_p0 }
   0xb   :  { %185 = shalt.err (!%p182_p4)
}
   0xc   :  { %s233_s15 = smov 128   ;;  %s234_s16 = smov 8  }
   0xd   :  { %22 = dma.hbm_to_vmem [thread:$0]  %s286_s0, 256, %s17_s13, [#allocation4], %s233_s15, %s233_s15, %s234_s16  }
   0xe   :  { %s235_s19 = smov [#allocation6]  }
   0xf   :  { %s28_s20 = sshll.u32 %s235_s19, 4  ;;  %s29_s20 = int_to_ptr.vmem [resolvable:$true] %s28_s20 }
  0x10   :  { %s194_s21 = scalar_lea.vmem %s29_s20, 512  ;;  %p199_p6 = scmp.lt.s32.totalorder %s29_s20, %s29_s20 }
  0x11   :  { %p195_p5 = scmp.ne.s32.totalorder %s29_s20, %s194_s21  ;;  %p200_p7 = scmp.lt.s32.totalorder %s194_s21, %s194_s21 }
  0x13   :  { %p201_p8 = por %p200_p7, %p199_p6 }
  0x15   :  { %p202_p9 = pnand %p201_p8, %p195_p5 }
  0x17   :  { %205 = shalt.err (!%p202_p9)
}
  0x18   :  { %34 = dma.hbm_to_vmem [thread:$0]  %s287_s1, 512, %s29_s20, [#allocation7], %s233_s15, %s233_s15, %s234_s16  }
  0x19   :  { %226 = dma.done.wait [#allocation4], 256  }
  0x1a   :  { %227 = vsyncadd [#allocation4], 4294967040 }
  0x1b   :  { %228 = dma.done.wait [#allocation7], 512  }
  0x1c   :  { %229 = vsyncadd [#allocation7], 4294966784  ;;  %vm48_vm0 = vcmask 785408   ;;  %v236_v0 = vmov 0.0   ;;  %vm237_vm1 = vmmov 0   ;;  %v58_v1 = vld [vmem:[#allocation6 + $0x10] sm:$0xff] }
  0x1d   :  { %49 = vst.msk [vmem:[#allocation2] sm:$0xff] %vm48_vm0, %v236_v0  ;;  %50 = vst.msk [vmem:[#allocation2 + $0x8] sm:$0xff] %vm48_vm0, %v236_v0  ;;  %151 = vmatprep.subr.bf16.mxu0 %v236_v0  ;;  %155 = vmatprep.mubr.msk.bf16.mxu0 %vm237_vm1, %v236_v0  ;;  %v59_v2 = vld [vmem:[#allocation6 + $0x18] sm:$0xff]  ;;  %v56_v3 = vld [vmem:[#allocation6] sm:$0xff]  ;;  %vm62_vm2 = vcmask 261120   ;;  %s238_s24 = smov [#allocation8]  }
  0x1e   :  { %v61_v4 = vpack.c.bf16 %v59_v2, %v58_v1  ;;  %v57_v5 = vld [vmem:[#allocation6 + $0x8] sm:$0xff]  ;;  %v53_v7 = vld [vmem:[#allocation3] sm:$0xff]  ;;  %v54_v8 = vld [vmem:[#allocation3 + $0x8] sm:$0xff]  ;;  %s133_s25 = sshll.u32 %s238_s24, 4  ;;  %s134_s25 = int_to_ptr.vmem [resolvable:$true] %s133_s25 }
  0x1f   :  { %v60_v6 = vpack.c.bf16 %v57_v5, %v56_v3  ;;  %v55_v9 = vpack.c.bf16 %v54_v8, %v53_v7  ;;  %v147_v18 = vld [vmem:[%s288_s2] ss:$0 sm:$0xff]  ;;  %s206_s26 = scalar_lea.vmem %s134_s25, 256  ;;  %p211_p11 = scmp.lt.s32.totalorder %s134_s25, %s134_s25 }
  0x20   :  { %152 = vmatpush3.bf16.msra.mxu0 %v61_v4  ;;  %p207_p10 = scmp.ne.s32.totalorder %s134_s25, %s206_s26  ;;  %p212_p12 = scmp.lt.s32.totalorder %s206_s26, %s206_s26 }
  0x21   :  { %153 = vmatprep.subr.bf16.mxu0 %v236_v0 }
  0x22   :  { %p213_p13 = por %p212_p12, %p211_p11 }
  0x24   :  { %154 = vmatpush3.bf16.msra.mxu0 %v60_v6  ;;  %v51_v10 = vld [vmem:[#allocation2] sm:$0xff]  ;;  %v52_v14 = vld [vmem:[#allocation2 + $0x8] sm:$0xff]  ;;  %p214_p0 = pnand %p213_p13, %p207_p10 }
  0x27   :  { %156 = vmatmul.mubr.msk.bf16.vlgmr.msra.gmra.mxu0 %vm62_vm2, %v55_v9 }
  0xe7   :  { %v100_v11 = vpop.f32.mrf.mxu0 }
  0xe8   :  { %v107_v12 = vadd.f32 %v100_v11, %v51_v10 }
  0xe9   :  { %v157_v13 = vpop.f32.mrf.mxu0 }
  0xea   :  { %110 = vst.msk [vmem:[#allocation2] sm:$0xff] %vm48_vm0, %v107_v12 }
  0xeb   :  { %v103_v15 = vpop.f32.mrf.mxu0 }
  0xec   :  { %v108_v16 = vadd.f32 %v103_v15, %v52_v14 }
  0xed   :  { %v158_v17 = vpop.f32.mrf.mxu0 }
  0xee   :  { %111 = vst.msk [vmem:[#allocation2 + $0x8] sm:$0xff] %vm48_vm0, %v108_v16 }
  0xf1   :  { %v115_v19 = vld [vmem:[#allocation2] sm:$0xff] }
  0xf2   :  { %v124_v20 = vadd.f32 %v147_v18, %v115_v19 }
  0xf4   :  { %126 = vst.msk [vmem:[#allocation8] sm:$0xff] %vm48_vm0, %v124_v20 }
  0xf5   :  { %v116_v21 = vld [vmem:[#allocation2 + $0x8] sm:$0xff] }
  0xf6   :  { %v125_v22 = vadd.f32 %v147_v18, %v116_v21 }
  0xf8   :  { %127 = vst.msk [vmem:[#allocation8 + $0x8] sm:$0xff] %vm48_vm0, %v125_v22 }
  0xf9   :  { %217 = shalt.err (!%p214_p0)
}
  0xfa   :  { %139 = dma.vmem_to_hbm [thread:$0]  %s134_s25, 256, %s289_s3, [#allocation5], %s233_s15, %s233_s15, %s234_s16  }
  0xfb   :  { %230 = dma.done.wait [#allocation5], 256  }
  0xfc   :  { %231 = vsyncadd [#allocation5], 4294967040 }
  0xfd   :  { %143 = vsyncpa [#allocation4], 1 }
  0xfe   :  { %144 = vsyncpa [#allocation7], 1 }
  0xff   :  { %145 = vsyncpa [#allocation5], 1 }

</bundles_post_ra>
